<compile_context>
chip_gen: v5e
topology: v5e:2x2
jax: 0.10.0
libtpu: 0.0.40
codegen_flags: <defaults>
</compile_context>

<pallas_src>
import jax
import jax.numpy as jnp
from jax import lax
from jax.experimental import pallas as pl
from jax.experimental.pallas import tpu as pltpu


def policy_net_kernel(x_ref, w1_ref, b1_ref, w2_ref, b2_ref, o_ref):
    # Feature-major, lane-dense layout (batch on the 128-lane axis):
    #   x_ref : (2, TILE_B)    w1_ref: (16, 2)   b1_ref: (16, 1)
    #   w2_ref: (4, 16)        b2_ref: (4, 1)    o_ref : (4, TILE_B)
    x = x_ref[...]

    # fc1 on the MXU: (16,2) @ (2,TILE_B) -> (16,TILE_B). K=2 padding is free,
    # the MXU has no other work. Bias add + ReLU on the VPU.
    h = lax.dot_general(w1_ref[...], x, (((1,), (0,)), ((), ())),
                        preferred_element_type=jnp.float32)
    h = jnp.maximum(h + b1_ref[...], 0.0)

    # fc2 on the MXU: (4,16) @ (16,TILE_B) -> (4,TILE_B), then one bias add.
    logits = lax.dot_general(w2_ref[...], h, (((1,), (0,)), ((), ())),
                             preferred_element_type=jnp.float32)
    logits = logits + b2_ref[...]

    # Numerically stable softmax over the 4-action (sublane) axis.
    m = jnp.max(logits, axis=0, keepdims=True)     # (1, TILE_B)
    e = jnp.exp(logits - m)                        # EUP
    denom = jnp.sum(e, axis=0, keepdims=True)      # (1, TILE_B)
    # Exact divide (not approx reciprocal): rows sum to 1 at f32 precision.
    o_ref[...] = (e / denom).astype(o_ref.dtype)


def _round_up(n, m):
    return (n + m - 1) // m * m


def policy_net_forward_feature_major(x_t, w1, b1, w2, b2, *, tile_b=2048,
                                     out_dtype=jnp.float32):
    """Core kernel call: feature-major x_t [2, B] -> probabilities [4, B]."""
    B = x_t.shape[1]

    # Padding policy: round B up to a 128-lane multiple (waste <= 127 cols from
    # that alone), then pick >=2 equal tiles (each a multiple of 128) whenever
    # the padded batch allows, so v7x gets both TensorCores and the pipeline
    # has something to double-buffer. Extra padding from equal tiling is
    # bounded by ~n_steps*128 columns.
    b128 = _round_up(B, 128)
    min_steps = 2 if b128 >= 256 else 1
    n_steps = max(min_steps, pl.cdiv(b128, tile_b))
    tile = _round_up(pl.cdiv(B, n_steps), 128)
    bp = n_steps * tile

    # jnp.pad (fusable) instead of zeros+dynamic_update_slice.
    x_p = jnp.pad(x_t.astype(jnp.float32), ((0, 0), (0, bp - B)))
    b1c = b1.reshape(16, 1).astype(jnp.float32)
    b2c = b2.reshape(4, 1).astype(jnp.float32)

    out_t = pl.pallas_call(
        policy_net_kernel,
        out_shape=jax.ShapeDtypeStruct((4, bp), out_dtype),
        grid=(n_steps,),
        in_specs=[
            pl.BlockSpec((2, tile), lambda i: (0, i)),   # x tile (pipelined)
            pl.BlockSpec((16, 2), lambda i: (0, 0)),     # weights stay resident
            pl.BlockSpec((16, 1), lambda i: (0, 0)),
            pl.BlockSpec((4, 16), lambda i: (0, 0)),
            pl.BlockSpec((4, 1), lambda i: (0, 0)),
        ],
        out_specs=pl.BlockSpec((4, tile), lambda i: (0, i)),
        compiler_params=pltpu.CompilerParams(
            dimension_semantics=("parallel",)),          # shards across TCs on v7x
    )(x_p, w1.astype(jnp.float32), b1c, w2.astype(jnp.float32), b2c)

    return out_t[:, :B]


def policy_net_forward(x, w1, b1, w2, b2, *, tile_b=2048, out_dtype=jnp.float32):
    """PyTorch-facing forward: x [B, 2] -> softmax probabilities [B, 4].

    Weights use the PyTorch (out_features, in_features) layout:
      w1 [16, 2], b1 [16], w2 [4, 16], b2 [4].
    The transposes at this boundary exist only to honor the PyTorch layout;
    prefer policy_net_forward_feature_major if the caller can stay
    feature-major (saves two full HBM passes).
    """
    out_t = policy_net_forward_feature_major(
        x.T, w1, b1, w2, b2, tile_b=tile_b, out_dtype=out_dtype)
    return out_t.T


def init_params(key):
    """Deterministic init mirroring PyTorch nn.Linear defaults:
    U(-1/sqrt(fan_in), 1/sqrt(fan_in)); weights kept in torch (out, in) layout."""
    k1, k2, k3, k4 = jax.random.split(key, 4)
    bound1 = 1.0 / jnp.sqrt(2.0)
    w1 = jax.random.uniform(k1, (16, 2), jnp.float32, -bound1, bound1)
    b1 = jax.random.uniform(k2, (16,), jnp.float32, -bound1, bound1)
    bound2 = 1.0 / jnp.sqrt(16.0)
    w2 = jax.random.uniform(k3, (4, 16), jnp.float32, -bound2, bound2)
    b2 = jax.random.uniform(k4, (4,), jnp.float32, -bound2, bound2)
    return w1, b1, w2, b2


def _reference(x, w1, b1, w2, b2):
    h = jnp.maximum(x @ w1.T + b1, 0.0)
    logits = h @ w2.T + b2
    return jax.nn.softmax(logits, axis=1)


if __name__ == "__main__":
    key = jax.random.PRNGKey(0)
    kx, kx2, kp = jax.random.split(key, 3)
    w1, b1, w2, b2 = init_params(kp)

    # Small batch (single-tile path).
    B = 8  # fc1 implies 2 input features
    x = jax.random.normal(kx, (B, 2), jnp.float32)
    out = jax.block_until_ready(policy_net_forward(x, w1, b1, w2, b2))
    ref = _reference(x, w1, b1, w2, b2)
    assert out.shape == (B, 4)
    assert jnp.allclose(out, ref, atol=1e-5, rtol=1e-5)
    assert jnp.allclose(jnp.sum(out, axis=1), 1.0, atol=1e-5)

    # Non-multiple-of-128 batch exercising the padded, 2-step parallel grid.
    B2 = 272
    x2 = jax.random.normal(kx2, (B2, 2), jnp.float32)
    out2 = jax.block_until_ready(policy_net_forward(x2, w1, b1, w2, b2))
    ref2 = _reference(x2, w1, b1, w2, b2)
    assert out2.shape == (B2, 4)
    assert jnp.allclose(out2, ref2, atol=1e-5, rtol=1e-5)
    assert jnp.allclose(jnp.sum(out2, axis=1), 1.0, atol=1e-5)

    print("KERNEL_OK")
</pallas_src>

<mosaic_0001>
module attributes {stable_mosaic.version = 11 : i64} {
  func.func @policy_net_kernel(%arg0: i32, %arg1: memref<2x128xf32, #tpu.memory_space<vmem>>, %arg2: memref<16x2xf32, #tpu.memory_space<vmem>>, %arg3: memref<16x1xf32, #tpu.memory_space<vmem>>, %arg4: memref<4x16xf32, #tpu.memory_space<vmem>>, %arg5: memref<4x1xf32, #tpu.memory_space<vmem>>, %arg6: memref<4x128xf32, #tpu.memory_space<vmem>>) attributes {dimension_semantics = [#tpu.dimension_semantics<parallel>], iteration_bounds = array<i64: 1>, scalar_prefetch = 0 : i64, scratch_operands = 0 : i64, tpu.core_type = #tpu.core_type<tc>, window_params = [{transform_indices = @transform_0, window_bounds = array<i64: 2, 128>}, {pipeline_mode = #tpu.pipeline_mode<synchronous>, transform_indices = @transform_1, window_bounds = array<i64: 16, 2>}, {pipeline_mode = #tpu.pipeline_mode<synchronous>, transform_indices = @transform_2, window_bounds = array<i64: 16, 1>}, {pipeline_mode = #tpu.pipeline_mode<synchronous>, transform_indices = @transform_3, window_bounds = array<i64: 4, 16>}, {pipeline_mode = #tpu.pipeline_mode<synchronous>, transform_indices = @transform_4, window_bounds = array<i64: 4, 1>}, {transform_indices = @transform_5, window_bounds = array<i64: 4, 128>}]} {
    %c0 = arith.constant 0 : index
    %c0_0 = arith.constant 0 : index
    %0 = vector.load %arg1[%c0, %c0_0] : memref<2x128xf32, #tpu.memory_space<vmem>>, vector<2x128xf32>
    %c0_1 = arith.constant 0 : index
    %c0_2 = arith.constant 0 : index
    %1 = vector.load %arg2[%c0_1, %c0_2] : memref<16x2xf32, #tpu.memory_space<vmem>>, vector<16x2xf32>
    %cst = arith.constant dense<0.000000e+00> : vector<16x128xf32>
    %2 = tpu.matmul %1, %0, %cst {dimension_numbers = #tpu.dot_dimension_numbers<[1], [0], [0], [1], [0, 0, 1, 1], [], []>} : vector<16x2xf32>, vector<2x128xf32>, vector<16x128xf32> -> vector<16x128xf32>
    %c0_3 = arith.constant 0 : index
    %c0_4 = arith.constant 0 : index
    %3 = vector.load %arg3[%c0_3, %c0_4] : memref<16x1xf32, #tpu.memory_space<vmem>>, vector<16x1xf32>
    %4 = vector.broadcast %3 : vector<16x1xf32> to vector<16x128xf32>
    %5 = arith.addf %2, %4 : vector<16x128xf32>
    %cst_5 = arith.constant 0.000000e+00 : f32
    %6 = vector.broadcast %cst_5 : f32 to vector<16x128xf32>
    %7 = arith.maximumf %5, %6 : vector<16x128xf32>
    %c0_6 = arith.constant 0 : index
    %c0_7 = arith.constant 0 : index
    %8 = vector.load %arg4[%c0_6, %c0_7] : memref<4x16xf32, #tpu.memory_space<vmem>>, vector<4x16xf32>
    %cst_8 = arith.constant dense<0.000000e+00> : vector<4x128xf32>
    %9 = tpu.matmul %8, %7, %cst_8 {dimension_numbers = #tpu.dot_dimension_numbers<[1], [0], [0], [1], [0, 0, 1, 1], [], []>} : vector<4x16xf32>, vector<16x128xf32>, vector<4x128xf32> -> vector<4x128xf32>
    %c0_9 = arith.constant 0 : index
    %c0_10 = arith.constant 0 : index
    %10 = vector.load %arg5[%c0_9, %c0_10] : memref<4x1xf32, #tpu.memory_space<vmem>>, vector<4x1xf32>
    %11 = vector.broadcast %10 : vector<4x1xf32> to vector<4x128xf32>
    %12 = arith.addf %9, %11 : vector<4x128xf32>
    %cst_11 = arith.constant dense<0xFF800000> : vector<128xf32>
    %13 = vector.multi_reduction <maximumf>, %12, %cst_11 [0] : vector<4x128xf32> to vector<128xf32>
    %14 = vector.shape_cast %13 : vector<128xf32> to vector<1x128xf32>
    %15 = vector.broadcast %14 : vector<1x128xf32> to vector<4x128xf32>
    %16 = arith.subf %12, %15 : vector<4x128xf32>
    %17 = math.exp %16 : vector<4x128xf32>
    %cst_12 = arith.constant dense<0.000000e+00> : vector<128xf32>
    %18 = vector.multi_reduction <add>, %17, %cst_12 [0] : vector<4x128xf32> to vector<128xf32>
    %19 = vector.shape_cast %18 : vector<128xf32> to vector<1x128xf32>
    %20 = vector.broadcast %19 : vector<1x128xf32> to vector<4x128xf32>
    %21 = arith.divf %17, %20 : vector<4x128xf32>
    %c0_13 = arith.constant 0 : index
    %c0_14 = arith.constant 0 : index
    %22 = vector.load %arg6[%c0_13, %c0_14] : memref<4x128xf32, #tpu.memory_space<vmem>>, vector<4x128xf32>
    tpu.vector_store %arg6[%c0_13, %c0_14], %21 {strides = array<i32>} : memref<4x128xf32, #tpu.memory_space<vmem>>, vector<4x128xf32>,
    return
  }
  func.func @transform_0(%arg0: i32) -> (i32, i32) {
    %c0_i32 = arith.constant 0 : i32
    %c0_i32_0 = arith.constant 0 : i32
    return %c0_i32, %arg0 : i32, i32
  }
  func.func @transform_1(%arg0: i32) -> (i32, i32) {
    %c0_i32 = arith.constant 0 : i32
    %c0_i32_0 = arith.constant 0 : i32
    %c0_i32_1 = arith.constant 0 : i32
    return %c0_i32, %c0_i32_0 : i32, i32
  }
  func.func @transform_2(%arg0: i32) -> (i32, i32) {
    %c0_i32 = arith.constant 0 : i32
    %c0_i32_0 = arith.constant 0 : i32
    %c0_i32_1 = arith.constant 0 : i32
    return %c0_i32, %c0_i32_0 : i32, i32
  }
  func.func @transform_3(%arg0: i32) -> (i32, i32) {
    %c0_i32 = arith.constant 0 : i32
    %c0_i32_0 = arith.constant 0 : i32
    %c0_i32_1 = arith.constant 0 : i32
    return %c0_i32, %c0_i32_0 : i32, i32
  }
  func.func @transform_4(%arg0: i32) -> (i32, i32) {
    %c0_i32 = arith.constant 0 : i32
    %c0_i32_0 = arith.constant 0 : i32
    %c0_i32_1 = arith.constant 0 : i32
    return %c0_i32, %c0_i32_0 : i32, i32
  }
  func.func @transform_5(%arg0: i32) -> (i32, i32) {
    %c0_i32 = arith.constant 0 : i32
    %c0_i32_0 = arith.constant 0 : i32
    return %c0_i32, %arg0 : i32, i32
  }
}

</mosaic_0001>

<bundles_post_ra>
// kernel: tpu_custom_call.1
= control target key start
LH: loop header
LB: loop body
LE: loop exit
PB: predicated region body
PF: predicated region fallthrough
CT: control target
= control target key end

     0   :  { %vm43_vm0 = vcmask 1041408   ;;  %vm36_vm1 = vcmask 15360   ;;  %s248_s0 = inlined_call_operand.vmem [shape: f32[2,128], index: 0, kind: input, shape index: {}]   ;;  %s249_s1 = inlined_call_operand.vmem [shape: f32[16,2], index: 1, kind: input, shape index: {}]   ;;  %s250_s2 = inlined_call_operand.vmem [shape: f32[16,1], index: 2, kind: input, shape index: {}]   ;;  %s251_s3 = inlined_call_operand.vmem [shape: f32[4,16], index: 3, kind: input, shape index: {}]   ;;  %s252_s4 = inlined_call_operand.vmem [shape: f32[4,1], index: 4, kind: input, shape index: {}]   ;;  %s253_s5 = inlined_call_operand.hbm [shape: f32[4,128], index: 5, kind: output, shape index: {}]  }
   0x1   :  { %v21_v0 = vld [vmem:[%s248_s0] sm:$0x3]  ;;  %v23_v2 = vld [vmem:[%s249_s1 + $0x8] sm:$0xff] }
   0x2   :  { %v22_v1 = vld [vmem:[%s249_s1] sm:$0xff]  ;;  %153 = vmatpush.msk.msra.mxu0 %vm43_vm0, %v21_v0  ;;  %157 = vmatpush.msk.msra.mxu2 %vm43_vm0, %v21_v0  ;;  %v25_v3 = vld [vmem:[%s250_s2 + $0x8] sm:$0xff] }
   0x3   :  { %10 = vsyncpa [#allocation3], 0  ;;  %154 = vmatmul.msk.f32.vlgmr.msra.gmra.mxu0 %vm36_vm1, %v22_v1  ;;  %155 = vmatmul.msk.f32.vlgmr.msra.gmra.mxu2 %vm36_vm1, %v23_v2  ;;  %v192_v4 = vmov 0   ;;  %v24_v5 = vld [vmem:[%s250_s2] sm:$0xff]  ;;  %vm79_vm2 = vcmask 130048   ;;  %vm103_vm3 = vcmask 1043456  }
   0x4   :  { %160 = vset.pattern.permute.xlu0 %v192_v4  ;;  %161 = vset.pattern.permute.xlu1 %v192_v4  ;;  %v73_v6 = vld [vmem:[%s252_s4] sm:$0xf]  ;;  %s193_s2 = smov [#allocation2]   ;;  %s144_s6 = sshll.u32 %s253_s5, 4  ;;  %s145_s6 = int_to_ptr.hbm [resolvable:$true] %s144_s6 }
   0x5   :  { %33 = vperm.xlu0 %160, %v25_v3   ;;  %76 = vperm.xlu1 %161, %v73_v6   ;;  %v72_v15 = vld [vmem:[%s251_s3] sm:$0xf]  ;;  %s142_s3 = sshll.u32 %s193_s2, 4  ;;  %s143_s3 = int_to_ptr.vmem [resolvable:$true] %s142_s3 }
   0xd   :  { %28 = vperm.xlu0 %160, %v24_v5  }
  0x77   :  { %v34_v7 = vpop.permute.xlu0 %33  ;;  %v77_v16 = vpop.permute.xlu1 %76 }
  0x7f   :  { %v29_v8 = vpop.permute.xlu0 %28 }
  0x80   :  { %v64_v9 = vpop.f32.mrf.mxu0 }
  0x81   :  { %v65_v11 = vadd.f32 %v64_v9, %v29_v8 }
  0x83   :  { %v70_v14 = vmax.f32 %v65_v11, 0.0 }
  0x86   :  { %v67_v10 = vpop.f32.mrf.mxu2 }
  0x87   :  { %v68_v12 = vadd.f32 %v67_v10, %v34_v7 }
  0x89   :  { %v71_v13 = vmax.f32 %v68_v12, 0.0 }
  0x8b   :  { %97 = vmatpush.msra.mxu1 %v71_v13 }
  0x8d   :  { %98 = vmatpush.msra.mxu1 %v70_v14 }
  0x8e   :  { %156 = vmatmul.msk.f32.vlgmr.msra.gmra.mxu1 %vm79_vm2, %v72_v15 }
 0x10b   :  { %v100_v17 = vpop.f32.mrf.mxu1 }
 0x10c   :  { %v101_v18 = vadd.f32 %v100_v17, %v77_v16 }
 0x10e   :  { %v104_v19 = vsel %vm103_vm3, %v101_v18, -inf }
 0x10f   :  { %v105_v20 = vrot.slane %v104_v19, 4 }
 0x111   :  { %v106_v21 = vmax.f32 %v104_v19, %v105_v20 }
 0x113   :  { %v107_v22 = vrot.slane %v106_v21, 2 }
 0x115   :  { %v108_v23 = vmax.f32 %v106_v21, %v107_v22 }
 0x117   :  { %v109_v24 = vrot.slane %v108_v23, 1 }
 0x119   :  { %v110_v25 = vmax.f32 %v108_v23, %v109_v24 }
 0x11b   :  { %v111_v26 = vsub.f32 %v101_v18, %v110_v25 }
 0x11d   :  { %v112_v27 = vmul.f32 1.442695, %v111_v26 }
 0x11f   :  { %162 = vpow2.f32 %v112_v27 }
 0x125   :  { %v163_v28 = vpop.eup %162 }
 0x126   :  { %v114_v29 = vsel %vm103_vm3, %v163_v28, 0.0 }
 0x127   :  { %v115_v30 = vrot.slane %v114_v29, 4 }
 0x129   :  { %v116_v31 = vadd.f32 %v115_v30, %v114_v29 }
 0x12b   :  { %v117_v32 = vrot.slane %v116_v31, 2 }
 0x12d   :  { %v118_v33 = vadd.f32 %v117_v32, %v116_v31 }
 0x12f   :  { %v119_v34 = vrot.slane %v118_v33, 1 }
 0x131   :  { %v120_v35 = vadd.f32 %v119_v34, %v118_v33 }
 0x133   :  { %164 = vrcp.f32 %v120_v35  ;;  %v132_v39 = vand.u32 2147483648, %v120_v35  ;;  %v130_v41 = vand.u32 2147483647, %v120_v35  ;;  %vm126_vm5 = vweird.f32 %v120_v35 }
 0x135   :  { %v133_v43 = vor.u32 1.1754944e-38, %v132_v39  ;;  %vm131_vm7 = vcmp.eq.f32.partialorder %v130_v41, 8.507059e+37 }
 0x139   :  { %v165_v36 = vpop.eup %164 }
 0x13a   :  { %v122_v37 = vmul.f32 %v165_v36, %v120_v35  ;;  %vm127_vm4 = vweird.f32 %v165_v36 }
 0x13b   :  { %vm128_vm6 = vmor %vm126_vm5, %vm127_vm4 }
 0x13c   :  { %v123_v38 = vsub.f32 1.0, %v122_v37 }
 0x13e   :  { %v124_v40 = vmul.f32 %v165_v36, %v123_v38 }
 0x140   :  { %v125_v42 = vadd.f32 %v165_v36, %v124_v40 }
 0x142   :  { %v129_v44 = vsel %vm128_vm6, %v165_v36, %v125_v42 }
 0x143   :  { %v134_v45 = vsel %vm131_vm7, %v133_v43, %v129_v44 }
 0x144   :  { %v135_v46 = vmul.f32 %v163_v28, %v134_v45 }
 0x146   :  { %136 = vst [vmem:[#allocation2] sm:$0xf] %v135_v46 }
 0x147   :  { %147 = dma.vmem_to_hbm [thread:$0]  %s143_s3, 64, %s145_s6, [#allocation3]  }
 0x148   :  { %190 = dma.done.wait [#allocation3], 64  }
 0x149   :  { %191 = vsyncadd [#allocation3], 4294967232 }
 0x14a   :  { %152 = vsyncpa [#allocation3], 1 }

</bundles_post_ra>
